<compile_context>
chip_gen: v7x
topology: tpu7x:2x2x1
jax: 0.10.0
libtpu: 0.0.40
codegen_flags: <defaults>
</compile_context>

<pallas_src>
import numpy as np
import jax
import jax.numpy as jnp
from jax import lax
from jax.experimental import pallas as pl
from jax.experimental.pallas import tpu as pltpu


def bottleneck_forward(x_nchw,
                       conv1_weight, bn1_gamma, bn1_beta, bn1_mean, bn1_var,
                       conv2_weight, bn2_gamma, bn2_beta, bn2_mean, bn2_var,
                       shortcut=True, eps=1e-5):
    """Bottleneck.forward (eval-mode BN, act='silu', depthwise=False).

    x_nchw:       (N, C_in, H, W)
    conv1_weight: (C_h,  C_in, 1, 1)   nn.Conv2d(bias=False)
    conv2_weight: (C_out, C_h, 3, 3)   nn.Conv2d(bias=False), pad=1, stride=1
    returns:      (N, C_out, H, W)
    """
    N, C_in, H, W = x_nchw.shape
    C_h = conv1_weight.shape[0]
    C_out = conv2_weight.shape[0]
    HW = H * W
    use_add = bool(shortcut) and (C_in == C_out)

    cdt = x_nchw.dtype  # keep activations / weights in their native dtype

    # ---- fold eval-mode BatchNorm into conv weights / biases (tiny, done in f32) ----
    s1 = bn1_gamma.astype(jnp.float32) / jnp.sqrt(bn1_var.astype(jnp.float32) + eps)
    w1f = (conv1_weight.reshape(C_h, C_in).astype(jnp.float32) * s1[:, None]).astype(cdt)
    b1 = (bn1_beta.astype(jnp.float32) - bn1_mean.astype(jnp.float32) * s1).reshape(C_h, 1)

    s2 = bn2_gamma.astype(jnp.float32) / jnp.sqrt(bn2_var.astype(jnp.float32) + eps)
    w2f = conv2_weight.astype(jnp.float32) * s2[:, None, None, None]        # (C_out, C_h, 3, 3)
    w2t = jnp.transpose(w2f, (2, 3, 0, 1)).reshape(9, C_out, C_h).astype(cdt)  # t = ky*3+kx
    b2 = (bn2_beta.astype(jnp.float32) - bn2_mean.astype(jnp.float32) * s2).reshape(C_out, 1)

    # ---- per-tap validity masks (zero padding of the 3x3 conv), built once on host ----
    rr, cc = np.meshgrid(np.arange(H), np.arange(W), indexing="ij")
    rr = rr.reshape(-1)
    cc = cc.reshape(-1)
    masks_np = np.zeros((9, 1, HW), np.float32)
    for ky in range(3):
        for kx in range(3):
            dy, dx = ky - 1, kx - 1
            ok = (rr + dy >= 0) & (rr + dy < H) & (cc + dx >= 0) & (cc + dx < W)
            masks_np[ky * 3 + kx, 0, :] = ok.astype(np.float32)
    masks = jnp.asarray(masks_np, dtype=cdt)

    # Free metadata reshape (NCHW is contiguous): (N, C, H, W) -> (N, C, H*W).
    x3 = x_nchw.reshape(N, C_in, HW)

    def kernel(x_ref, w1_ref, w2_ref, b1_ref, b2_ref, m_ref, o_ref):
        x = x_ref[0]                                               # (C_in, HW), HW on lanes

        # conv1 (1x1) + folded BN + SiLU, f32 accumulation.
        h = jnp.dot(w1_ref[...], x, preferred_element_type=jnp.float32) + b1_ref[...]
        h = h * pl.reciprocal(1.0 + jnp.exp(-h), approx=True)      # SiLU (EUP reciprocal)
        h = h.astype(w2_ref.dtype)

        # conv2 (3x3, stride 1, pad 1) as 9 lane-rotated + masked matmuls.
        acc = jnp.zeros((C_out, HW), jnp.float32)
        for ky in range(3):
            for kx in range(3):
                t = ky * 3 + kx
                off = (ky - 1) * W + (kx - 1)                      # flattened spatial offset
                if off == 0:
                    tap = h
                else:
                    # shifted[:, p] = h[:, p + off]; wrapped lanes are zeroed by the mask.
                    tap = pltpu.roll(h, (-off) % HW, 1) * m_ref[t]
                acc = acc + jnp.dot(w2_ref[t], tap, preferred_element_type=jnp.float32)

        y = acc + b2_ref[...]
        y = y * pl.reciprocal(1.0 + jnp.exp(-y), approx=True)      # SiLU
        if use_add:
            y = y + x.astype(jnp.float32)                          # residual shortcut
        o_ref[...] = y[None].astype(o_ref.dtype)

    # TODO(synk): for very large feature maps (per-image C*H*W beyond VMEM) add spatial
    # tiling with a 1-row halo; the current grid tiles over the batch dimension only.
    out3 = pl.pallas_call(
        kernel,
        out_shape=jax.ShapeDtypeStruct((N, C_out, HW), cdt),
        grid_spec=pltpu.PrefetchScalarGridSpec(
            num_scalar_prefetch=0,
            grid=(N,),
            in_specs=[
                pl.BlockSpec((1, C_in, HW), lambda n: (n, 0, 0)),     # x (lane-dense)
                pl.BlockSpec((C_h, C_in), lambda n: (0, 0)),          # folded 1x1 weight
                pl.BlockSpec((9, C_out, C_h), lambda n: (0, 0, 0)),   # folded 3x3 taps
                pl.BlockSpec((C_h, 1), lambda n: (0, 0)),             # folded bias 1
                pl.BlockSpec((C_out, 1), lambda n: (0, 0)),           # folded bias 2
                pl.BlockSpec((9, 1, HW), lambda n: (0, 0, 0)),        # tap validity masks
            ],
            out_specs=pl.BlockSpec((1, C_out, HW), lambda n: (n, 0, 0)),
        ),
        compiler_params=pltpu.CompilerParams(
            dimension_semantics=("parallel",)),
    )(x3, w1f, w2t, b1, b2, masks)

    return out3.reshape(N, C_out, H, W)


def _reference(x, w1, g1, b1, m1, v1, w2, g2, b2, m2, v2, shortcut=True, eps=1e-5):
    """Pure-JAX reference of the same forward (eval-mode BN, SiLU)."""
    def bn(y, g, b, m, v):
        s = g / jnp.sqrt(v + eps)
        return y * s[None, :, None, None] + (b - m * s)[None, :, None, None]

    def silu(y):
        return y * jax.nn.sigmoid(y)

    dn = ("NCHW", "OIHW", "NCHW")
    h = silu(bn(lax.conv_general_dilated(x, w1, (1, 1), "SAME", dimension_numbers=dn),
                g1, b1, m1, v1))
    y = silu(bn(lax.conv_general_dilated(h, w2, (1, 1), "SAME", dimension_numbers=dn),
                g2, b2, m2, v2))
    if shortcut and x.shape[1] == w2.shape[0]:
        y = y + x
    return y


if __name__ == "__main__":
    key = jax.random.PRNGKey(0)
    ks = jax.random.split(key, 11)

    # Bottleneck(in_channels=4, out_channels=4, shortcut=True, expansion=0.5)
    N, C_in, H, W = 2, 4, 16, 16
    C_out = 4
    C_h = int(C_out * 0.5)  # hidden_channels = 2

    x = jax.random.normal(ks[0], (N, C_in, H, W), dtype=jnp.float32)
    w1 = 0.3 * jax.random.normal(ks[1], (C_h, C_in, 1, 1), dtype=jnp.float32)
    g1 = 1.0 + 0.1 * jax.random.normal(ks[2], (C_h,), dtype=jnp.float32)
    b1 = 0.1 * jax.random.normal(ks[3], (C_h,), dtype=jnp.float32)
    m1 = 0.1 * jax.random.normal(ks[4], (C_h,), dtype=jnp.float32)
    v1 = jnp.abs(jax.random.normal(ks[5], (C_h,), dtype=jnp.float32)) + 0.5
    w2 = 0.2 * jax.random.normal(ks[6], (C_out, C_h, 3, 3), dtype=jnp.float32)
    g2 = 1.0 + 0.1 * jax.random.normal(ks[7], (C_out,), dtype=jnp.float32)
    b2 = 0.1 * jax.random.normal(ks[8], (C_out,), dtype=jnp.float32)
    m2 = 0.1 * jax.random.normal(ks[9], (C_out,), dtype=jnp.float32)
    v2 = jnp.abs(jax.random.normal(ks[10], (C_out,), dtype=jnp.float32)) + 0.5

    out = bottleneck_forward(x, w1, g1, b1, m1, v1, w2, g2, b2, m2, v2, shortcut=True)
    out = jax.block_until_ready(out)

    ref = _reference(x, w1, g1, b1, m1, v1, w2, g2, b2, m2, v2, shortcut=True)
    assert out.shape == (N, C_out, H, W), out.shape
    # Tolerance covers the approximate-reciprocal SiLU; structural bugs would be O(0.1+).
    assert jnp.allclose(out, ref, atol=2e-2, rtol=2e-2), \
        float(jnp.max(jnp.abs(out - ref)))

    print("KERNEL_OK")
</pallas_src>

<mosaic_0001>
module attributes {stable_mosaic.version = 11 : i64} {
  func.func @kernel(%arg0: i32, %arg1: memref<1x4x256xf32, #tpu.memory_space<vmem>>, %arg2: memref<2x4xf32, #tpu.memory_space<vmem>>, %arg3: memref<9x4x2xf32, #tpu.memory_space<vmem>>, %arg4: memref<2x1xf32, #tpu.memory_space<vmem>>, %arg5: memref<4x1xf32, #tpu.memory_space<vmem>>, %arg6: memref<9x1x256xf32, #tpu.memory_space<vmem>>, %arg7: memref<1x4x256xf32, #tpu.memory_space<vmem>>) attributes {dimension_semantics = [#tpu.dimension_semantics<parallel>], iteration_bounds = array<i64: 2>, scalar_prefetch = 0 : i64, scratch_operands = 0 : i64, tpu.core_type = #tpu.core_type<tc>, window_params = [{transform_indices = @transform_0, window_bounds = array<i64: 1, 4, 256>}, {pipeline_mode = #tpu.pipeline_mode<synchronous>, transform_indices = @transform_1, window_bounds = array<i64: 2, 4>}, {pipeline_mode = #tpu.pipeline_mode<synchronous>, transform_indices = @transform_2, window_bounds = array<i64: 9, 4, 2>}, {pipeline_mode = #tpu.pipeline_mode<synchronous>, transform_indices = @transform_3, window_bounds = array<i64: 2, 1>}, {pipeline_mode = #tpu.pipeline_mode<synchronous>, transform_indices = @transform_4, window_bounds = array<i64: 4, 1>}, {pipeline_mode = #tpu.pipeline_mode<synchronous>, transform_indices = @transform_5, window_bounds = array<i64: 9, 1, 256>}, {transform_indices = @transform_6, window_bounds = array<i64: 1, 4, 256>}]} {
    %c0 = arith.constant 0 : index
    %c0_0 = arith.constant 0 : index
    %c0_1 = arith.constant 0 : index
    %0 = vector.load %arg1[%c0, %c0_0, %c0_1] : memref<1x4x256xf32, #tpu.memory_space<vmem>>, vector<1x4x256xf32>
    %1 = vector.shape_cast %0 : vector<1x4x256xf32> to vector<4x256xf32>
    %c0_2 = arith.constant 0 : index
    %c0_3 = arith.constant 0 : index
    %2 = vector.load %arg2[%c0_2, %c0_3] : memref<2x4xf32, #tpu.memory_space<vmem>>, vector<2x4xf32>
    %cst = arith.constant dense<0.000000e+00> : vector<2x256xf32>
    %3 = tpu.matmul %2, %1, %cst {dimension_numbers = #tpu.dot_dimension_numbers<[1], [0], [0], [1], [0, 0, 1, 1], [], []>} : vector<2x4xf32>, vector<4x256xf32>, vector<2x256xf32> -> vector<2x256xf32>
    %c0_4 = arith.constant 0 : index
    %c0_5 = arith.constant 0 : index
    %4 = vector.load %arg4[%c0_4, %c0_5] : memref<2x1xf32, #tpu.memory_space<vmem>>, vector<2x1xf32>
    %5 = vector.broadcast %4 : vector<2x1xf32> to vector<2x256xf32>
    %6 = arith.addf %3, %5 : vector<2x256xf32>
    %cst_6 = arith.constant 0.000000e+00 : f32
    %7 = vector.broadcast %cst_6 : f32 to vector<2x256xf32>
    %8 = arith.subf %7, %6 : vector<2x256xf32>
    %9 = math.exp %8 : vector<2x256xf32>
    %cst_7 = arith.constant 1.000000e+00 : f32
    %10 = vector.broadcast %cst_7 : f32 to vector<2x256xf32>
    %11 = arith.addf %10, %9 : vector<2x256xf32>
    %12 = tpu.reciprocal %11 {approx = true} : vector<2x256xf32> -> vector<2x256xf32>
    %13 = arith.mulf %6, %12 : vector<2x256xf32>
    %cst_8 = arith.constant 0.000000e+00 : f32
    %14 = vector.broadcast %cst_8 : f32 to vector<4x256xf32>
    %c17_i32 = arith.constant 17 : i32
    %15 = tpu.dynamic_rotate %13 by %c17_i32 dim 1 : vector<2x256xf32>, i32 -> vector<2x256xf32>
    %c0_9 = arith.constant 0 : index
    %c0_10 = arith.constant 0 : index
    %c0_11 = arith.constant 0 : index
    %16 = vector.load %arg6[%c0_9, %c0_10, %c0_11] : memref<9x1x256xf32, #tpu.memory_space<vmem>>, vector<1x1x256xf32>
    %17 = vector.shape_cast %16 : vector<1x1x256xf32> to vector<1x256xf32>
    %18 = vector.broadcast %17 : vector<1x256xf32> to vector<2x256xf32>
    %19 = arith.mulf %15, %18 : vector<2x256xf32>
    %c0_12 = arith.constant 0 : index
    %c0_13 = arith.constant 0 : index
    %c0_14 = arith.constant 0 : index
    %20 = vector.load %arg3[%c0_12, %c0_13, %c0_14] : memref<9x4x2xf32, #tpu.memory_space<vmem>>, vector<1x4x2xf32>
    %21 = vector.shape_cast %20 : vector<1x4x2xf32> to vector<4x2xf32>
    %cst_15 = arith.constant dense<0.000000e+00> : vector<4x256xf32>
    %22 = tpu.matmul %21, %19, %cst_15 {dimension_numbers = #tpu.dot_dimension_numbers<[1], [0], [0], [1], [0, 0, 1, 1], [], []>} : vector<4x2xf32>, vector<2x256xf32>, vector<4x256xf32> -> vector<4x256xf32>
    %23 = arith.addf %14, %22 : vector<4x256xf32>
    %c16_i32 = arith.constant 16 : i32
    %24 = tpu.dynamic_rotate %13 by %c16_i32 dim 1 : vector<2x256xf32>, i32 -> vector<2x256xf32>
    %c1 = arith.constant 1 : index
    %c0_16 = arith.constant 0 : index
    %c0_17 = arith.constant 0 : index
    %25 = vector.load %arg6[%c1, %c0_16, %c0_17] : memref<9x1x256xf32, #tpu.memory_space<vmem>>, vector<1x1x256xf32>
    %26 = vector.shape_cast %25 : vector<1x1x256xf32> to vector<1x256xf32>
    %27 = vector.broadcast %26 : vector<1x256xf32> to vector<2x256xf32>
    %28 = arith.mulf %24, %27 : vector<2x256xf32>
    %c1_18 = arith.constant 1 : index
    %c0_19 = arith.constant 0 : index
    %c0_20 = arith.constant 0 : index
    %29 = vector.load %arg3[%c1_18, %c0_19, %c0_20] : memref<9x4x2xf32, #tpu.memory_space<vmem>>, vector<1x4x2xf32>
    %30 = vector.shape_cast %29 : vector<1x4x2xf32> to vector<4x2xf32>
    %cst_21 = arith.constant dense<0.000000e+00> : vector<4x256xf32>
    %31 = tpu.matmul %30, %28, %cst_21 {dimension_numbers = #tpu.dot_dimension_numbers<[1], [0], [0], [1], [0, 0, 1, 1], [], []>} : vector<4x2xf32>, vector<2x256xf32>, vector<4x256xf32> -> vector<4x256xf32>
    %32 = arith.addf %23, %31 : vector<4x256xf32>
    %c15_i32 = arith.constant 15 : i32
    %33 = tpu.dynamic_rotate %13 by %c15_i32 dim 1 : vector<2x256xf32>, i32 -> vector<2x256xf32>
    %c2 = arith.constant 2 : index
    %c0_22 = arith.constant 0 : index
    %c0_23 = arith.constant 0 : index
    %34 = vector.load %arg6[%c2, %c0_22, %c0_23] : memref<9x1x256xf32, #tpu.memory_space<vmem>>, vector<1x1x256xf32>
    %35 = vector.shape_cast %34 : vector<1x1x256xf32> to vector<1x256xf32>
    %36 = vector.broadcast %35 : vector<1x256xf32> to vector<2x256xf32>
    %37 = arith.mulf %33, %36 : vector<2x256xf32>
    %c2_24 = arith.constant 2 : index
    %c0_25 = arith.constant 0 : index
    %c0_26 = arith.constant 0 : index
    %38 = vector.load %arg3[%c2_24, %c0_25, %c0_26] : memref<9x4x2xf32, #tpu.memory_space<vmem>>, vector<1x4x2xf32>
    %39 = vector.shape_cast %38 : vector<1x4x2xf32> to vector<4x2xf32>
    %cst_27 = arith.constant dense<0.000000e+00> : vector<4x256xf32>
    %40 = tpu.matmul %39, %37, %cst_27 {dimension_numbers = #tpu.dot_dimension_numbers<[1], [0], [0], [1], [0, 0, 1, 1], [], []>} : vector<4x2xf32>, vector<2x256xf32>, vector<4x256xf32> -> vector<4x256xf32>
    %41 = arith.addf %32, %40 : vector<4x256xf32>
    %c1_i32 = arith.constant 1 : i32
    %42 = tpu.dynamic_rotate %13 by %c1_i32 dim 1 : vector<2x256xf32>, i32 -> vector<2x256xf32>
    %c3 = arith.constant 3 : index
    %c0_28 = arith.constant 0 : index
    %c0_29 = arith.constant 0 : index
    %43 = vector.load %arg6[%c3, %c0_28, %c0_29] : memref<9x1x256xf32, #tpu.memory_space<vmem>>, vector<1x1x256xf32>
    %44 = vector.shape_cast %43 : vector<1x1x256xf32> to vector<1x256xf32>
    %45 = vector.broadcast %44 : vector<1x256xf32> to vector<2x256xf32>
    %46 = arith.mulf %42, %45 : vector<2x256xf32>
    %c3_30 = arith.constant 3 : index
    %c0_31 = arith.constant 0 : index
    %c0_32 = arith.constant 0 : index
    %47 = vector.load %arg3[%c3_30, %c0_31, %c0_32] : memref<9x4x2xf32, #tpu.memory_space<vmem>>, vector<1x4x2xf32>
    %48 = vector.shape_cast %47 : vector<1x4x2xf32> to vector<4x2xf32>
    %cst_33 = arith.constant dense<0.000000e+00> : vector<4x256xf32>
    %49 = tpu.matmul %48, %46, %cst_33 {dimension_numbers = #tpu.dot_dimension_numbers<[1], [0], [0], [1], [0, 0, 1, 1], [], []>} : vector<4x2xf32>, vector<2x256xf32>, vector<4x256xf32> -> vector<4x256xf32>
    %50 = arith.addf %41, %49 : vector<4x256xf32>
    %c4 = arith.constant 4 : index
    %c0_34 = arith.constant 0 : index
    %c0_35 = arith.constant 0 : index
    %51 = vector.load %arg3[%c4, %c0_34, %c0_35] : memref<9x4x2xf32, #tpu.memory_space<vmem>>, vector<1x4x2xf32>
    %52 = vector.shape_cast %51 : vector<1x4x2xf32> to vector<4x2xf32>
    %cst_36 = arith.constant dense<0.000000e+00> : vector<4x256xf32>
    %53 = tpu.matmul %52, %13, %cst_36 {dimension_numbers = #tpu.dot_dimension_numbers<[1], [0], [0], [1], [0, 0, 1, 1], [], []>} : vector<4x2xf32>, vector<2x256xf32>, vector<4x256xf32> -> vector<4x256xf32>
    %54 = arith.addf %50, %53 : vector<4x256xf32>
    %c255_i32 = arith.constant 255 : i32
    %55 = tpu.dynamic_rotate %13 by %c255_i32 dim 1 : vector<2x256xf32>, i32 -> vector<2x256xf32>
    %c5 = arith.constant 5 : index
    %c0_37 = arith.constant 0 : index
    %c0_38 = arith.constant 0 : index
    %56 = vector.load %arg6[%c5, %c0_37, %c0_38] : memref<9x1x256xf32, #tpu.memory_space<vmem>>, vector<1x1x256xf32>
    %57 = vector.shape_cast %56 : vector<1x1x256xf32> to vector<1x256xf32>
    %58 = vector.broadcast %57 : vector<1x256xf32> to vector<2x256xf32>
    %59 = arith.mulf %55, %58 : vector<2x256xf32>
    %c5_39 = arith.constant 5 : index
    %c0_40 = arith.constant 0 : index
    %c0_41 = arith.constant 0 : index
    %60 = vector.load %arg3[%c5_39, %c0_40, %c0_41] : memref<9x4x2xf32, #tpu.memory_space<vmem>>, vector<1x4x2xf32>
    %61 = vector.shape_cast %60 : vector<1x4x2xf32> to vector<4x2xf32>
    %cst_42 = arith.constant dense<0.000000e+00> : vector<4x256xf32>
    %62 = tpu.matmul %61, %59, %cst_42 {dimension_numbers = #tpu.dot_dimension_numbers<[1], [0], [0], [1], [0, 0, 1, 1], [], []>} : vector<4x2xf32>, vector<2x256xf32>, vector<4x256xf32> -> vector<4x256xf32>
    %63 = arith.addf %54, %62 : vector<4x256xf32>
    %c241_i32 = arith.constant 241 : i32
    %64 = tpu.dynamic_rotate %13 by %c241_i32 dim 1 : vector<2x256xf32>, i32 -> vector<2x256xf32>
    %c6 = arith.constant 6 : index
    %c0_43 = arith.constant 0 : index
    %c0_44 = arith.constant 0 : index
    %65 = vector.load %arg6[%c6, %c0_43, %c0_44] : memref<9x1x256xf32, #tpu.memory_space<vmem>>, vector<1x1x256xf32>
    %66 = vector.shape_cast %65 : vector<1x1x256xf32> to vector<1x256xf32>
    %67 = vector.broadcast %66 : vector<1x256xf32> to vector<2x256xf32>
    %68 = arith.mulf %64, %67 : vector<2x256xf32>
    %c6_45 = arith.constant 6 : index
    %c0_46 = arith.constant 0 : index
    %c0_47 = arith.constant 0 : index
    %69 = vector.load %arg3[%c6_45, %c0_46, %c0_47] : memref<9x4x2xf32, #tpu.memory_space<vmem>>, vector<1x4x2xf32>
    %70 = vector.shape_cast %69 : vector<1x4x2xf32> to vector<4x2xf32>
    %cst_48 = arith.constant dense<0.000000e+00> : vector<4x256xf32>
    %71 = tpu.matmul %70, %68, %cst_48 {dimension_numbers = #tpu.dot_dimension_numbers<[1], [0], [0], [1], [0, 0, 1, 1], [], []>} : vector<4x2xf32>, vector<2x256xf32>, vector<4x256xf32> -> vector<4x256xf32>
    %72 = arith.addf %63, %71 : vector<4x256xf32>
    %c240_i32 = arith.constant 240 : i32
    %73 = tpu.dynamic_rotate %13 by %c240_i32 dim 1 : vector<2x256xf32>, i32 -> vector<2x256xf32>
    %c7 = arith.constant 7 : index
    %c0_49 = arith.constant 0 : index
    %c0_50 = arith.constant 0 : index
    %74 = vector.load %arg6[%c7, %c0_49, %c0_50] : memref<9x1x256xf32, #tpu.memory_space<vmem>>, vector<1x1x256xf32>
    %75 = vector.shape_cast %74 : vector<1x1x256xf32> to vector<1x256xf32>
    %76 = vector.broadcast %75 : vector<1x256xf32> to vector<2x256xf32>
    %77 = arith.mulf %73, %76 : vector<2x256xf32>
    %c7_51 = arith.constant 7 : index
    %c0_52 = arith.constant 0 : index
    %c0_53 = arith.constant 0 : index
    %78 = vector.load %arg3[%c7_51, %c0_52, %c0_53] : memref<9x4x2xf32, #tpu.memory_space<vmem>>, vector<1x4x2xf32>
    %79 = vector.shape_cast %78 : vector<1x4x2xf32> to vector<4x2xf32>
    %cst_54 = arith.constant dense<0.000000e+00> : vector<4x256xf32>
    %80 = tpu.matmul %79, %77, %cst_54 {dimension_numbers = #tpu.dot_dimension_numbers<[1], [0], [0], [1], [0, 0, 1, 1], [], []>} : vector<4x2xf32>, vector<2x256xf32>, vector<4x256xf32> -> vector<4x256xf32>
    %81 = arith.addf %72, %80 : vector<4x256xf32>
    %c239_i32 = arith.constant 239 : i32
    %82 = tpu.dynamic_rotate %13 by %c239_i32 dim 1 : vector<2x256xf32>, i32 -> vector<2x256xf32>
    %c8 = arith.constant 8 : index
    %c0_55 = arith.constant 0 : index
    %c0_56 = arith.constant 0 : index
    %83 = vector.load %arg6[%c8, %c0_55, %c0_56] : memref<9x1x256xf32, #tpu.memory_space<vmem>>, vector<1x1x256xf32>
    %84 = vector.shape_cast %83 : vector<1x1x256xf32> to vector<1x256xf32>
    %85 = vector.broadcast %84 : vector<1x256xf32> to vector<2x256xf32>
    %86 = arith.mulf %82, %85 : vector<2x256xf32>
    %c8_57 = arith.constant 8 : index
    %c0_58 = arith.constant 0 : index
    %c0_59 = arith.constant 0 : index
    %87 = vector.load %arg3[%c8_57, %c0_58, %c0_59] : memref<9x4x2xf32, #tpu.memory_space<vmem>>, vector<1x4x2xf32>
    %88 = vector.shape_cast %87 : vector<1x4x2xf32> to vector<4x2xf32>
    %cst_60 = arith.constant dense<0.000000e+00> : vector<4x256xf32>
    %89 = tpu.matmul %88, %86, %cst_60 {dimension_numbers = #tpu.dot_dimension_numbers<[1], [0], [0], [1], [0, 0, 1, 1], [], []>} : vector<4x2xf32>, vector<2x256xf32>, vector<4x256xf32> -> vector<4x256xf32>
    %90 = arith.addf %81, %89 : vector<4x256xf32>
    %c0_61 = arith.constant 0 : index
    %c0_62 = arith.constant 0 : index
    %91 = vector.load %arg5[%c0_61, %c0_62] : memref<4x1xf32, #tpu.memory_space<vmem>>, vector<4x1xf32>
    %92 = vector.broadcast %91 : vector<4x1xf32> to vector<4x256xf32>
    %93 = arith.addf %90, %92 : vector<4x256xf32>
    %cst_63 = arith.constant 0.000000e+00 : f32
    %94 = vector.broadcast %cst_63 : f32 to vector<4x256xf32>
    %95 = arith.subf %94, %93 : vector<4x256xf32>
    %96 = math.exp %95 : vector<4x256xf32>
    %cst_64 = arith.constant 1.000000e+00 : f32
    %97 = vector.broadcast %cst_64 : f32 to vector<4x256xf32>
    %98 = arith.addf %97, %96 : vector<4x256xf32>
    %99 = tpu.reciprocal %98 {approx = true} : vector<4x256xf32> -> vector<4x256xf32>
    %100 = arith.mulf %93, %99 : vector<4x256xf32>
    %101 = arith.addf %100, %1 : vector<4x256xf32>
    %102 = vector.shape_cast %101 : vector<4x256xf32> to vector<1x4x256xf32>
    %c0_65 = arith.constant 0 : index
    %c0_66 = arith.constant 0 : index
    %c0_67 = arith.constant 0 : index
    %103 = vector.load %arg7[%c0_65, %c0_66, %c0_67] : memref<1x4x256xf32, #tpu.memory_space<vmem>>, vector<1x4x256xf32>
    tpu.vector_store %arg7[%c0_65, %c0_66, %c0_67], %102 {strides = array<i32>} : memref<1x4x256xf32, #tpu.memory_space<vmem>>, vector<1x4x256xf32>,
    return
  }
  func.func @transform_0(%arg0: i32) -> (i32, i32, i32) {
    %c0_i32 = arith.constant 0 : i32
    %c0_i32_0 = arith.constant 0 : i32
    %c0_i32_1 = arith.constant 0 : i32
    return %arg0, %c0_i32, %c0_i32_0 : i32, i32, i32
  }
  func.func @transform_1(%arg0: i32) -> (i32, i32) {
    %c0_i32 = arith.constant 0 : i32
    %c0_i32_0 = arith.constant 0 : i32
    %c0_i32_1 = arith.constant 0 : i32
    return %c0_i32, %c0_i32_0 : i32, i32
  }
  func.func @transform_2(%arg0: i32) -> (i32, i32, i32) {
    %c0_i32 = arith.constant 0 : i32
    %c0_i32_0 = arith.constant 0 : i32
    %c0_i32_1 = arith.constant 0 : i32
    %c0_i32_2 = arith.constant 0 : i32
    return %c0_i32, %c0_i32_0, %c0_i32_1 : i32, i32, i32
  }
  func.func @transform_3(%arg0: i32) -> (i32, i32) {
    %c0_i32 = arith.constant 0 : i32
    %c0_i32_0 = arith.constant 0 : i32
    %c0_i32_1 = arith.constant 0 : i32
    return %c0_i32, %c0_i32_0 : i32, i32
  }
  func.func @transform_4(%arg0: i32) -> (i32, i32) {
    %c0_i32 = arith.constant 0 : i32
    %c0_i32_0 = arith.constant 0 : i32
    %c0_i32_1 = arith.constant 0 : i32
    return %c0_i32, %c0_i32_0 : i32, i32
  }
  func.func @transform_5(%arg0: i32) -> (i32, i32, i32) {
    %c0_i32 = arith.constant 0 : i32
    %c0_i32_0 = arith.constant 0 : i32
    %c0_i32_1 = arith.constant 0 : i32
    %c0_i32_2 = arith.constant 0 : i32
    return %c0_i32, %c0_i32_0, %c0_i32_1 : i32, i32, i32
  }
  func.func @transform_6(%arg0: i32) -> (i32, i32, i32) {
    %c0_i32 = arith.constant 0 : i32
    %c0_i32_0 = arith.constant 0 : i32
    %c0_i32_1 = arith.constant 0 : i32
    return %arg0, %c0_i32, %c0_i32_0 : i32, i32, i32
  }
}

</mosaic_0001>

<bundles_post_ra>
// kernel: tpu_custom_call.1
= control target key start
LH: loop header
LB: loop body
LE: loop exit
PB: predicated region body
PF: predicated region fallthrough
CT: control target
= control target key end

     0   :  { %11 = vsyncpa [#allocation3], 0  ;;  %s1878_s0 = inlined_call_operand.vmem [shape: f32[2,4,256], index: 0, kind: input, shape index: {}]   ;;  %s1879_s1 = inlined_call_operand.vmem [shape: f32[2,4], index: 1, kind: input, shape index: {}]   ;;  %s1880_s2 = inlined_call_operand.vmem [shape: f32[9,4,2], index: 2, kind: input, shape index: {}]   ;;  %s1881_s3 = inlined_call_operand.vmem [shape: f32[2,1], index: 3, kind: input, shape index: {}]   ;;  %s1882_s4 = inlined_call_operand.vmem [shape: f32[4,1], index: 4, kind: input, shape index: {}]   ;;  %s1883_s5 = inlined_call_operand.vmem [shape: f32[9,1,256], index: 5, kind: input, shape index: {}]   ;;  %s1884_s6 = inlined_call_operand.hbm [shape: f32[2,4,256], index: 6, kind: output, shape index: {}]  }
   0x1   :  { %13 = vsyncpa [#allocation3 + $0x1], 0  ;;  %s1637_s21 = smov 0   ;;  %s1639_s22 = smov 0  }
   0x2   :  { %s1641_s23 = smov 0   ;;  %s1643_s24 = smov 0  }
   0x3 LB: > { %s1658_s25 = sadd.s32 4294967295, %s1589_s24   ;;  %s1384_s26 = sadd.s32 4294967294, %s1589_s24   ;;  %s1589_s24 = sphi %s1643_s24, %s1890_s24   ;;  %s1585_s23 = sphi %s1641_s23, %s1889_s23   ;;  %s1581_s22 = sphi %s1639_s22, %s1888_s22   ;;  %s1577_s21 = sphi %s1637_s21, %s1887_s21  }
   0x4   : > { %s1662_s27 = sadd.s32 1, %s1589_s24   ;;  %s157_s28 = sadd.s32 1, %s1585_s23 }
   0x5   : > { %s154_s29 = ssub.s32 %s1589_s24, %s1662_s27  ;;  %p167_p0 = scmp.ne.s32.totalorder %s1585_s23, %s1581_s22 }
   0x6   : > { %p155_p1 = scmp.eq.s32.totalorder %s154_s29, 0  ;;  %p168_p2 = scmp.eq.s32.totalorder %s1658_s25, 1 }
   0x7   : > { %p173_p3 = scmp.ne.s32.totalorder %s1581_s22, %s1577_s21  ;;  %p174_p4 = scmp.eq.s32.totalorder %s1384_s26, 1 }
   0x8   : > { %s1673_s30 = scalar_select %p155_p1, %s1585_s23, %s157_s28  }
   0x9   : > { %p1675_p5 = por %p168_p2, %p167_p0  ;;  %p1679_p6 = por %p174_p4, %p173_p3 }
   0xa   : > { %p1387_p7 = scmp.ge.s32.totalorder %s1589_s24, 1  ;;  %p215_p8 = scmp.lt.s32.totalorder %s1589_s24, 3 }
   0xc   : > { %p216_p9 = pnand %p1387_p7, %p215_p8 }
   0xd   : > { %p245_p10 = scmp.lt.s32.totalorder (!%p216_p9), %s1658_s25, 1  ;;  %v1591_v0 = vmov (!%p216_p9), 0.0   ;;  %v252_v1 = vld [vmem:[%s1881_s3] sm:$0x3] (!%p216_p9)  ;;  %v1592_v2 = vmov (!%p216_p9), 0   ;;  %vm264_vm0 = vcmask (!%p216_p9), 1043456   ;;  %v356_v25 = vlaneseq (!%p216_p9) }
   0xe   : > { %219 = sbr.rel (%p216_p9) target bundleno = 687 (0x2af), region = 44  ;;  %333 = vmatprep.mubr.f32.mxu0 (!%p216_p9), %v1591_v0  ;;  %849 = vmatprep.mubr.f32.mxu1 (!%p216_p9), %v1591_v0  ;;  %v251_v5 = vld [vmem:[%s1879_s1] sm:$0x3] (!%p216_p9)  ;;  %vm260_vm1 = vcmask (!%p216_p9), 31744   ;;  %vm404_vm2 = vcmask (!%p216_p9), 1041408   ;;  %s1593_s18 = smov (!%p216_p9), 127  }
   0xf   : > { %1508 = vset.pattern.permute.xlu0 (!%p216_p9), %v1592_v2  ;;  %1509 = vset.pattern.permute.xlu1 (!%p216_p9), %v1592_v2  ;;  %s1594_s19 = smov (!%p216_p9), 16   ;;  %vm400_vm3 = vcmask (!%p216_p9), 15360   ;;  %v1412_v23 = vld [vmem:[%s1880_s2 + $0x10] sm:$0xf] (!%p216_p9)  ;;  %s1595_s28 = smov (!%p216_p9), 17   ;;  %v364_v26 = vshrl.u32 (!%p216_p9), %v356_v25, 7 }
  0x10   : > { %255 = vperm.xlu0 (!%p216_p9), %1508, %v252_v1   ;;  %s1596_s29 = smov (!%p216_p9), 113   ;;  %s1597_s9 = smov (!%p216_p9), 15   ;;  %v1282_v24 = vld [vmem:[%s1882_s4] sm:$0xf] (!%p216_p9)  ;;  %v1717_v27 = vand.u32 (!%p216_p9), 127, %v356_v25 }
  0x11   : > { %s1598_s10 = smov (!%p216_p9), 112   ;;  %v1719_v28 = vsub.s32 (!%p216_p9), 0, %v364_v26  ;;  %v1721_v29 = vsub.s32 (!%p216_p9), 1, %v364_v26  ;;  %v1394_v30 = vld [vmem:[%s1883_s5 + $0x2] sm:$0x3] (!%p216_p9)  ;;  %s242_s17 = sand.u32 (!%p216_p9), 1, %s1581_s22  }
  0x12   : > { %v1416_v31 = vld [vmem:[%s1883_s5 + $0xa] sm:$0x3] (!%p216_p9)  ;;  %vm380_vm4 = vcmp.lt.s32.totalorder (!%p216_p9), %v1717_v27, 16  ;;  %v361_v35 = vld [vmem:[%s1883_s5] sm:$0x3] (!%p216_p9)  ;;  %vm862_vm5 = vcmp.lt.s32.totalorder (!%p216_p9), %v1717_v27, 127 }
  0x13   : > { %v389_v34 = vrot.slane (!%p216_p9), %v1394_v30, %v1719_v28  ;;  %v393_v36 = vrot.slane (!%p216_p9), %v1394_v30, %v1721_v29  ;;  %v871_v37 = vrot.slane (!%p216_p9), %v1416_v31, %v1719_v28  ;;  %v875_v38 = vrot.slane (!%p216_p9), %v1416_v31, %v1721_v29  ;;  %v1421_v51 = vld [vmem:[%s1883_s5 + $0xc] sm:$0x3] (!%p216_p9)  ;;  %v1395_v52 = vld [vmem:[%s1880_s2 + $0x4] sm:$0xf] (!%p216_p9)  ;;  %v1417_v53 = vld [vmem:[%s1880_s2 + $0x14] sm:$0xf] (!%p216_p9) }
  0x14   : > { %vm358_vm6 = vcmp.lt.s32.totalorder (!%p216_p9), %v1717_v27, 17  ;;  %v366_v41 = vrot.slane (!%p216_p9), %v361_v35, %v1719_v28  ;;  %v370_v42 = vrot.slane (!%p216_p9), %v361_v35, %v1721_v29  ;;  %v977_v58 = vrot.slane (!%p216_p9), %v1421_v51, %v1719_v28  ;;  %v1402_v62 = vld [vmem:[%s1883_s5 + $0x4] sm:$0x3] (!%p216_p9)  ;;  %v1427_v35 = vld [vmem:[%s1880_s2 + $0x1c] sm:$0xf] (!%p216_p9) }
  0x15   : > { %s246_s11 = scalar_select %p245_p10, %s1658_s25, 1  ;;  %vm968_vm7 = vcmp.lt.s32.totalorder %v1717_v27, 113  ;;  %v981_v61 = vrot.slane %v1421_v51, %v1721_v29  ;;  %vm566_vm8 = vcmp.lt.s32.totalorder %v1717_v27, 15  ;;  %vm1074_vm9 = vcmp.lt.s32.totalorder %v1717_v27, 112 }
  0x16   : > { %vm672_vm10 = vcmp.lt.s32.totalorder %v1717_v27, 1  ;;  %vm1180_vm11 = vcmp.lt.s32.totalorder %v1717_v27, 111  ;;  %v1408_v27 = vld [vmem:[%s1880_s2 + $0xc] sm:$0xf] }
  0x17   : > { %s1441_s12 = sshll.u32 %s246_s11, 3  ;;  %s1599_s11 = smov 1  }
  0x18   : > { %s249_s15 = scalar_lea.vmem %s1878_s0, %s1441_s12  ;;  %s1600_s12 = smov 111  }
  0x19   : > { %v1695_v3 = vld [vmem:[%s249_s15] sm:$0xff] }
  0x1a   : > { %v1699_v4 = vcombine.high %v1695_v3, %v1695_v3 }
  0x1c   : > { %1391 = vmatprep.subr.msk.mxu0 %vm264_vm0, %v1699_v4 }
  0x1d   : > { %1392 = vmatpush1.msk.msra.mxu0 %vm264_vm0, %v1695_v3 }
  0x1e   : > { %1393 = vmatmul.mubr.msk.f32.vlgmr.msra.gmra.mrb[0].mxu0 %vm260_vm1, %v251_v5 }
  0x1f   : > { %475 = vmatprep.mubr.f32.mxu0 %v1591_v0 }
  0x8f   : > { %v256_v6 = vpop.permute.xlu0 %255 }
  0xf1   : > { %v335_v7 = vpop.f32.mrb[0].mxu0 }
  0xf2   : > { %v336_v8 = vadd.f32 %v335_v7, %v256_v6  ;;  %v337_v9 = vpop.f32.mrb[1].mxu0 }
  0xf3   : > { %v338_v10 = vadd.f32 %v337_v9, %v256_v6  ;;  %v579_v9 = vrot.slane %v1402_v62, %v1721_v29 }
  0xf4   : > { %v340_v11 = vsub.f32 0.0, %v336_v8 }
  0xf5   : > { %v341_v12 = vsub.f32 0.0, %v338_v10 }
  0xf6   : > { %v342_v13 = vmul.f32 1.442695, %v340_v11  ;;  %v375_v11 = vld [vmem:[%s1880_s2] sm:$0xf] }
  0xf7   : > { %v344_v14 = vmul.f32 1.442695, %v341_v12  ;;  %v1422_v12 = vld [vmem:[%s1880_s2 + $0x18] sm:$0xf] }
  0xf8   : > { %1511 = vpow2.f32 %v342_v13 }
  0xf9   : > { %1513 = vpow2.f32 %v344_v14 }
 0x102   : > { %v1512_v15 = vpop.eup %1511 }
 0x103   : > { %v1514_v16 = vpop.eup %1513  ;;  %v346_v17 = vadd.f32 1.0, %v1512_v15 }
 0x104   : > { %v347_v18 = vadd.f32 1.0, %v1514_v16 }
 0x105   : > { %1515 = vrcp.f32 %v346_v17 }
 0x106   : > { %1517 = vrcp.f32 %v347_v18 }
 0x10f   : > { %v1516_v19 = vpop.eup %1515 }
 0x110   : > { %v1518_v20 = vpop.eup %1517  ;;  %v350_v21 = vmul.f32 %v1516_v19, %v336_v8  ;;  %v575_v8 = vrot.slane %v1402_v62, %v1719_v28 }
 0x111   : > { %v351_v22 = vmul.f32 %v1518_v20, %v338_v10  ;;  %v1426_v10 = vld [vmem:[%s1883_s5 + $0xe] sm:$0x3] }
 0x112   : > { %858 = vrot.lane.b32.xlu1 %v350_v21, %s1593_s18  ;;  %376 = vrot.lane.b32.xlu0 %v350_v21, %s1594_s19  ;;  %v1083_v17 = vrot.slane %v1426_v10, %v1719_v28  ;;  %v1087_v20 = vrot.slane %v1426_v10, %v1721_v29 }
 0x113   : > { %1413 = vmatprep.subr.msk.mxu1 %vm404_vm2, %v351_v22 }
 0x114   : > { %1414 = vmatpush1.msk.msra.mxu1 %vm404_vm2, %v350_v21 }
 0x115   : > { %1415 = vmatmul.mubr.msk.f32.vlgmr.msra.gmra.mrb[0].mxu1 %vm400_vm3, %v1412_v23 }
 0x116   : > { %378 = vrot.lane.b32.xlu1 %v351_v22, %s1594_s19  ;;  %860 = vrot.lane.b32.xlu0 %v351_v22, %s1593_s18  ;;  %s1388_s18 = sshll.u32 %s242_s17, 3  ;;  %s1442_s19 = sshll.u32 %s1658_s25, 7 }
 0x117   : > { %955 = vmatprep.mubr.f32.mxu1 %v1591_v0  ;;  %s244_s20 = scalar_lea.vmem [#allocation2], %s1388_s18  ;;  %s1601_s25 = smov [#allocation2]  }
 0x118   : > { %s1325_s26 = sshll.u32 %s244_s20, 4  ;;  %s1838_s26 = int_to_ptr.vmem [resolvable:$true] %s1325_s26 }
 0x11a   : > { %352 = vrot.lane.b32.xlu1 %v350_v21, %s1595_s28  ;;  %354 = vrot.lane.b32.xlu0 %v351_v22, %s1595_s28 }
 0x11e   : > { %964 = vrot.lane.b32.xlu1 %v350_v21, %s1596_s29  ;;  %966 = vrot.lane.b32.xlu0 %v351_v22, %s1596_s29 }
 0x122   : > { %562 = vrot.lane.b32.xlu1 %v350_v21, %s1597_s9  ;;  %564 = vrot.lane.b32.xlu0 %v351_v22, %s1597_s9  ;;  %s1836_s9 = scalar_lea.hbm %s1884_s6, %s1442_s19 }
 0x126   : > { %1070 = vrot.lane.b32.xlu1 %v350_v21, %s1598_s10  ;;  %1072 = vrot.lane.b32.xlu0 %v351_v22, %s1598_s10  ;;  %s1311_s10 = scalar_lea.sflag [#allocation3], %s242_s17 }
 0x12a   : > { %668 = vrot.lane.b32.xlu1 %v350_v21, %s1599_s11  ;;  %670 = vrot.lane.b32.xlu0 %v351_v22, %s1599_s11  ;;  %s1527_s11 = scalar_lea.vmem %s1838_s26, 128 }
 0x12b   : > { %p1528_p11 = scmp.ne.s32.totalorder %s1838_s26, %s1527_s11 }
 0x12d   : > { %p1529_p12 = pnand %p1528_p11, %p1675_p5 }
 0x12e   : > { %1176 = vrot.lane.b32.xlu1 %v350_v21, %s1600_s12  ;;  %1178 = vrot.lane.b32.xlu0 %v351_v22, %s1600_s12  ;;  %v1407_v21 = vld [vmem:[%s1883_s5 + $0x6] sm:$0x3]  ;;  %s1531_s12 = sshll.u32 %s1601_s25, 4  ;;  %s1532_s12 = int_to_ptr.vmem [resolvable:$false] %s1531_s12 }
 0x12f   : > { %v681_v31 = vrot.slane %v1407_v21, %v1719_v28  ;;  %p1530_p13 = pneg %p1529_p12  ;;  %s1533_s13 = scalar_lea.vmem %s1532_s12, 256 }
 0x130   : > { %p1534_p0 = scmp.lt.s32.totalorder %s1838_s26, %s1532_s12  ;;  %p1535_p1 = scmp.lt.s32.totalorder %s1533_s13, %s1527_s11 }
 0x132   : > { %1285 = vperm.xlu1 %1509, %v1282_v24   ;;  %p1536_p2 = por %p1535_p1, %p1534_p0 }
 0x134   : > { %p1537_p3 = pnand %p1536_p2, %p1530_p13 }
 0x184   : > { %v859_v32 = vpop.permute.xlu1 %858  ;;  %v377_v33 = vpop.permute.xlu0 %376 }
 0x188   : > { %v379_v39 = vpop.permute.xlu1 %378  ;;  %v861_v40 = vpop.permute.xlu0 %860 }
 0x189   : > { %v381_v43 = vsel %vm380_vm4, %v377_v33, %v379_v39  ;;  %v382_v44 = vsel %vm380_vm4, %v379_v39, %v377_v33  ;;  %v863_v45 = vsel %vm862_vm5, %v859_v32, %v861_v40  ;;  %v864_v46 = vsel %vm862_vm5, %v861_v40, %v859_v32  ;;  %v1431_v33 = vld [vmem:[%s1883_s5 + $0x10] sm:$0x3] }
 0x18a   : > { %v396_v47 = vmul.f32 %v389_v34, %v382_v44  ;;  %v397_v48 = vmul.f32 %v393_v36, %v381_v43  ;;  %v878_v49 = vmul.f32 %v871_v37, %v863_v45  ;;  %v879_v50 = vmul.f32 %v875_v38, %v864_v46  ;;  %v1403_v34 = vld [vmem:[%s1880_s2 + $0x8] sm:$0xf] }
 0x18b   : > { %v685_v32 = vrot.slane %v1407_v21, %v1721_v29  ;;  %v1189_v40 = vrot.slane %v1431_v33, %v1719_v28  ;;  %v1193_v43 = vrot.slane %v1431_v33, %v1721_v29  ;;  %v1432_v29 = vld [vmem:[%s1880_s2 + $0x20] sm:$0xf] }
 0x18c   : > { %v353_v54 = vpop.permute.xlu1 %352  ;;  %1396 = vmatprep.subr.msk.mxu0 %vm404_vm2, %v397_v48  ;;  %v355_v55 = vpop.permute.xlu0 %354  ;;  %1418 = vmatprep.subr.msk.mxu1 %vm404_vm2, %v879_v50 }
 0x18d   : > { %v359_v56 = vsel %vm358_vm6, %v353_v54, %v355_v55  ;;  %v360_v57 = vsel %vm358_vm6, %v355_v55, %v353_v54  ;;  %1397 = vmatpush1.msk.msra.mxu0 %vm404_vm2, %v396_v47  ;;  %1419 = vmatpush1.msk.msra.mxu1 %vm404_vm2, %v878_v49 }
 0x18e   : > { %v373_v59 = vmul.f32 %v366_v41, %v360_v57  ;;  %v374_v60 = vmul.f32 %v370_v42, %v359_v56  ;;  %1398 = vmatmul.mubr.msk.f32.vlgmr.msra.gmra.mrb[2].mxu0 %vm400_vm3, %v1395_v52  ;;  %1420 = vmatmul.mubr.msk.f32.vlgmr.msra.gmra.mrb[0].mxu1 %vm400_vm3, %v1417_v53 }
 0x18f   : > { %555 = vmatprep.mubr.f32.mxu0 %v1591_v0  ;;  %1061 = vmatprep.mubr.f32.mxu1 %v1591_v0 }
 0x190   : > { %v965_v63 = vpop.permute.xlu1 %964  ;;  %1399 = vmatprep.subr.msk.mxu0 %vm404_vm2, %v374_v60  ;;  %v967_v1 = vpop.permute.xlu0 %966 }
 0x191   : > { %v969_v2 = vsel %vm968_vm7, %v965_v63, %v967_v1  ;;  %v970_v5 = vsel %vm968_vm7, %v967_v1, %v965_v63  ;;  %1400 = vmatpush1.msk.msra.mxu0 %vm404_vm2, %v373_v59 }
 0x192   : > { %v984_v6 = vmul.f32 %v977_v58, %v969_v2  ;;  %v985_v7 = vmul.f32 %v981_v61, %v970_v5 }
 0x194   : > { %v563_v13 = vpop.permute.xlu1 %562  ;;  %v565_v14 = vpop.permute.xlu0 %564  ;;  %1423 = vmatprep.subr.msk.mxu1 %vm404_vm2, %v985_v7 }
 0x195   : > { %v567_v15 = vsel %vm566_vm8, %v563_v13, %v565_v14  ;;  %v568_v16 = vsel %vm566_vm8, %v565_v14, %v563_v13  ;;  %1424 = vmatpush1.msk.msra.mxu1 %vm404_vm2, %v984_v6 }
 0x196   : > { %v582_v18 = vmul.f32 %v575_v8, %v568_v16  ;;  %v583_v19 = vmul.f32 %v579_v9, %v567_v15  ;;  %1401 = vmatmul.mubr.msk.f32.vlgmr.msra.gmra.mrb[2].mxu0 %vm400_vm3, %v375_v11  ;;  %1425 = vmatmul.mubr.msk.f32.vlgmr.msra.gmra.mrb[0].mxu1 %vm400_vm3, %v1422_v12 }
 0x197   : > { %659 = vmatprep.mubr.f32.mxu0 %v1591_v0  ;;  %1167 = vmatprep.mubr.f32.mxu1 %v1591_v0 }
 0x198   : > { %v1071_v22 = vpop.permute.xlu1 %1070  ;;  %1404 = vmatprep.subr.msk.mxu0 %vm404_vm2, %v583_v19  ;;  %v1073_v23 = vpop.permute.xlu0 %1072 }
 0x199   : > { %v1075_v24 = vsel %vm1074_vm9, %v1071_v22, %v1073_v23  ;;  %v1076_v25 = vsel %vm1074_vm9, %v1073_v23, %v1071_v22  ;;  %1405 = vmatpush1.msk.msra.mxu0 %vm404_vm2, %v582_v18 }
 0x19a   : > { %v1090_v26 = vmul.f32 %v1083_v17, %v1075_v24  ;;  %v1091_v30 = vmul.f32 %v1087_v20, %v1076_v25 }
 0x19c   : > { %v669_v36 = vpop.permute.xlu1 %668  ;;  %v671_v37 = vpop.permute.xlu0 %670  ;;  %1428 = vmatprep.subr.msk.mxu1 %vm404_vm2, %v1091_v30 }
 0x19d   : > { %v673_v38 = vsel %vm672_vm10, %v669_v36, %v671_v37  ;;  %v674_v39 = vsel %vm672_vm10, %v671_v37, %v669_v36  ;;  %1429 = vmatpush1.msk.msra.mxu1 %vm404_vm2, %v1090_v26 }
 0x19e   : > { %v688_v41 = vmul.f32 %v681_v31, %v674_v39  ;;  %v689_v42 = vmul.f32 %v685_v32, %v673_v38  ;;  %1406 = vmatmul.mubr.msk.f32.vlgmr.msra.gmra.mrb[2].mxu0 %vm400_vm3, %v1403_v34  ;;  %1430 = vmatmul.mubr.msk.f32.vlgmr.msra.gmra.mrb[0].mxu1 %vm400_vm3, %v1427_v35 }
 0x19f   : > { %765 = vmatprep.mubr.f32.mxu0 %v1591_v0  ;;  %1273 = vmatprep.mubr.f32.mxu1 %v1591_v0 }
 0x1a0   : > { %v1177_v44 = vpop.permute.xlu1 %1176  ;;  %1409 = vmatprep.subr.msk.mxu0 %vm404_vm2, %v689_v42  ;;  %v1179_v45 = vpop.permute.xlu0 %1178 }
 0x1a1   : > { %v1181_v46 = vsel %vm1180_vm11, %v1177_v44, %v1179_v45  ;;  %v1182_v28 = vsel %vm1180_vm11, %v1179_v45, %v1177_v44  ;;  %1410 = vmatpush1.msk.msra.mxu0 %vm404_vm2, %v688_v41 }
 0x1a2   : > { %v1196_v47 = vmul.f32 %v1189_v40, %v1181_v46  ;;  %v1197_v48 = vmul.f32 %v1193_v43, %v1182_v28 }
 0x1a4   : > { %1433 = vmatprep.subr.msk.mxu1 %vm404_vm2, %v1197_v48 }
 0x1a5   : > { %1434 = vmatpush1.msk.msra.mxu1 %vm404_vm2, %v1196_v47 }
 0x1a6   : > { %1411 = vmatmul.mubr.msk.f32.vlgmr.msra.gmra.mrb[2].mxu0 %vm400_vm3, %v1408_v27  ;;  %1435 = vmatmul.mubr.msk.f32.vlgmr.msra.gmra.mrb[0].mxu1 %vm400_vm3, %v1432_v29 }
 0x1b1   : > { %v1286_v0 = vpop.permute.xlu1 %1285 }
 0x279   : > { %v767_v49 = vpop.f32.mrb[2].mxu0  ;;  %v1275_v50 = vpop.f32.mrb[0].mxu1 }
 0x27a   : > { %v1443_v51 = vadd.f32 %v1275_v50, %v767_v49  ;;  %v769_v52 = vpop.f32.mrb[3].mxu0  ;;  %v1277_v53 = vpop.f32.mrb[1].mxu1 }
 0x27b   : > { %v1444_v54 = vadd.f32 %v1277_v53, %v769_v52 }
 0x27c   : > { %v1288_v55 = vadd.f32 %v1443_v51, %v1286_v0 }
 0x27d   : > { %v1289_v56 = vadd.f32 %v1444_v54, %v1286_v0 }
 0x27e   : > { %v1290_v57 = vsub.f32 0.0, %v1288_v55 }
 0x27f   : > { %v1291_v58 = vsub.f32 0.0, %v1289_v56 }
 0x280   : > { %v1292_v59 = vmul.f32 1.442695, %v1290_v57 }
 0x281   : > { %v1294_v60 = vmul.f32 1.442695, %v1291_v58 }
 0x282   : > { %1519 = vpow2.f32 %v1292_v59 }
 0x283   : > { %1521 = vpow2.f32 %v1294_v60 }
 0x28c   : > { %v1520_v61 = vpop.eup %1519 }
 0x28d   : > { %v1522_v62 = vpop.eup %1521  ;;  %v1296_v63 = vadd.f32 1.0, %v1520_v61 }
 0x28e   : > { %v1297_v1 = vadd.f32 1.0, %v1522_v62 }
 0x28f   : > { %1523 = vrcp.f32 %v1296_v63 }
 0x290   : > { %1525 = vrcp.f32 %v1297_v1 }
 0x299   : > { %v1524_v2 = vpop.eup %1523 }
 0x29a   : > { %v1526_v5 = vpop.eup %1525  ;;  %v1300_v6 = vmul.f32 %v1524_v2, %v1288_v55 }
 0x29b   : > { %v1301_v7 = vmul.f32 %v1526_v5, %v1289_v56 }
 0x29c   : > { %v1303_v8 = vadd.f32 %v1300_v6, %v1695_v3 }
 0x29d   : > { %v1304_v9 = vadd.f32 %v1301_v7, %v1699_v4 }
 0x29f   : > { %v1307_v10 = vcombine.low %v1303_v8, %v1304_v9 }
 0x2a1   : > { %1309 = vst [vmem:[%s244_s20] sm:$0xff] %v1307_v10 }
 0x2a2   : > { %1540 = shalt.err (!%p1537_p3)
}
 0x2a3   : > { %s1541_s14 = scalar_lea.hbm %s1836_s9, 128  ;;  %s1545_s17 = scalar_lea.hbm %s1884_s6, 256 }
 0x2a4   : > { %p1542_p4 = scmp.ne.s32.totalorder %s1836_s9, %s1541_s14  ;;  %p1546_p9 = scmp.lt.u32.totalorder %s1836_s9, %s1884_s6 }
 0x2a5   : > { %p1547_p10 = scmp.lt.u32.totalorder %s1545_s17, %s1541_s14  ;;  %p1549_p12 = scmp.lt.u32.totalorder %s1541_s14, %s1836_s9 }
 0x2a6   : > { %p1543_p7 = pnand %p1542_p4, %p1675_p5 }
 0x2a7   : > { %p1548_p11 = por %p1547_p10, %p1546_p9 }
 0x2a8   : > { %p1544_p8 = pneg %p1543_p7 }
 0x2a9   : > { %p1550_p13 = por %p1549_p12, %p1548_p11 }
 0x2ab   : > { %p1551_p0 = pnand %p1550_p13, %p1544_p8 }
 0x2ad   : > { %1554 = shalt.err (!%p1551_p0)
}
 0x2ae   : > { %1459 = dma.vmem_to_hbm [thread:$0]  (%p1675_p5), %s1838_s26, 128, %s1836_s9, %s1311_s10  }
 0x2af PF: > { %p1465_p1 = scmp.ge.s32.totalorder %s1589_s24, 2  ;;  %s1337_s20 = sand.u32 1, %s1577_s21  }
 0x2b0   : > { %s1338_s28 = scalar_lea.sflag [#allocation3], %s1337_s20 }
 0x2b1   : > { %p1462_p2 = pnand %p1465_p1, %p1679_p6 }
 0x2b3   : > { %1572 = dma.done.wait (!%p1462_p2), %s1338_s28, 128  }
 0x2b4   : > { %1574 = vsyncadd (!%p1462_p2), %s1338_s28, 4294967168  ;;  %p16_p3 = scmp.ge.s32.totalorder %s1662_s27, 4   ;;  %s1887_s21 = smov %s1581_s22 }
 0x2b5   : > { %s1888_s22 = smov %s1585_s23  ;;  %s1889_s23 = smov %s1673_s30 }
 0x2b6   : > { %s1890_s24 = smov %s1662_s27  ;;  %18 = sbr.rel (!%p16_p3) target bundleno = 3 (0x3), region = 94 }
 0x2bd   :  { %1343 = vsyncpa [#allocation3], 1 }
 0x2be   :  { %1345 = vsyncpa [#allocation3 + $0x1], 1 }

</bundles_post_ra>
